<compile_context>
chip_gen: v7x
topology: tpu7x:2x2x1
jax: 0.10.0
libtpu: 0.0.40
codegen_flags: <defaults>
</compile_context>

<pallas_src>
import functools
import numpy as np

import jax
import jax.numpy as jnp
from jax.experimental import pallas as pl
from jax.experimental.pallas import tpu as pltpu

IN_CH = 128 * 3   # 384, input channels of conv_cls / conv_box
NUM_OUT = 9       # 1 cls + 8 box-regression channels
PAD_OUT = 16      # padded to a sublane multiple for the MXU result


def _head_decode_kernel(x_ref, wt_ref, b_ref, xy_ref,
                        cls_ref, box_ref, dec_ref,
                        *, scale_x, scale_y, off_x, off_y):
    # x_ref: (C, tn) spatial slab — channels on sublanes, pixels on lanes.
    x = x_ref[...].astype(jnp.float32)
    wt = wt_ref[...]                  # (16, C): row 0 = cls, rows 1..8 = box
    b = b_ref[...]                    # (16, 1)

    # Fused 1x1 convs == one MXU matmul; result (16, tn) is lane-dense.
    y = jnp.dot(wt, x, preferred_element_type=jnp.float32) + b

    cls_ref[...] = y[0:1, :]          # (1, tn) lane-dense store
    box = y[1:1 + 8, :]               # (8, tn)
    box_ref[...] = box

    # CenterPoint generate_predicted_boxes decode.  In this transposed layout
    # each box channel is a full tn-lane row (sublane slice), so the decode
    # stays whole-vreg VPU/EUP work — no single-live-lane vregs, no XLU lane
    # shuffles.
    xy = xy_ref[...]                  # (2, tn): row 0 = w index, row 1 = h index
    xs = (xy[0:1, :] + box[0:1, :]) * scale_x + off_x
    ys = (xy[1:2, :] + box[1:2, :]) * scale_y + off_y
    # rows: [xs, ys, hei, exp(dim) x3, rots, rotc]
    dec_ref[...] = jnp.concatenate(
        [xs, ys, box[2:3, :], jnp.exp(box[3:6, :]), box[6:8, :]], axis=0)


@functools.partial(
    jax.jit,
    static_argnames=('voxel_size', 'lidar_range', 'out_size_factor', 'tn',
                     'input_dtype'))
def centerpoint_head_forward(spatial_features_2d, params, *,
                             voxel_size, lidar_range, out_size_factor,
                             tn=1024, input_dtype=jnp.float32):
    N, C, H, W = spatial_features_2d.shape
    assert C == IN_CH
    HW = H * W

    # Spatial tile: as large as possible (<= tn) with the lane dim a multiple
    # of 128, or the full extent.  Non-divisible HW is handled by a partial
    # (masked) last block — no "HW % tile == 0" requirement.
    if HW <= tn:
        tile = HW
    else:
        tile = max((tn // 128) * 128, 128)
    grid = (N, pl.cdiv(HW, tile))

    # Free reshape: NCHW is contiguous over (H, W), so (N, C, H*W) moves no data.
    x = spatial_features_2d.reshape(N, C, HW).astype(input_dtype)

    # Fused + padded head weights: (16, C) so the MXU result has channels on
    # sublanes and pixels on lanes.
    w9 = jnp.concatenate([params['w_cls'], params['w_box']], axis=1).T  # (9, C)
    wt = jnp.zeros((PAD_OUT, C), jnp.float32).at[:NUM_OUT].set(
        w9.astype(jnp.float32))
    b9 = jnp.concatenate([params['b_cls'], params['b_box']], axis=0)
    b = jnp.zeros((PAD_OUT, 1), jnp.float32).at[:NUM_OUT, 0].set(
        b9.astype(jnp.float32))

    # Tiny (2, HW) pixel-index table (w_idx, h_idx): removes in-kernel int
    # div/mod; ~0.5% of the feature-map HBM traffic.
    cols = jnp.arange(HW, dtype=jnp.int32)
    xy = jnp.stack([(cols % W).astype(jnp.float32),
                    (cols // W).astype(jnp.float32)], axis=0)             # (2, HW)

    scale_x = float(out_size_factor) * float(voxel_size[0])
    scale_y = float(out_size_factor) * float(voxel_size[1])
    off_x = float(lidar_range[0])
    off_y = float(lidar_range[1])

    kernel = functools.partial(_head_decode_kernel,
                               scale_x=scale_x, scale_y=scale_y,
                               off_x=off_x, off_y=off_y)

    in_bytes = jnp.dtype(input_dtype).itemsize
    cost = pl.CostEstimate(
        flops=2 * N * HW * C * PAD_OUT,
        transcendentals=3 * N * HW,
        bytes_accessed=(N * C * HW * in_bytes            # feature map (dominant)
                        + (1 + 8 + 8) * N * HW * 4       # three outputs
                        + 2 * HW * 4                     # pixel-index table
                        + PAD_OUT * (C + 1) * 4))        # weights + bias

    # VMEM/step: 2 x (C*tile*in_bytes) for x + small weight/xy/output buffers
    # (~3.3 MiB at tile=1024 f32) — fits the default scoped VMEM on v5e/v6e/v7x.
    cls_o, box_o, dec_o = pl.pallas_call(
        kernel,
        out_shape=(jax.ShapeDtypeStruct((N, 1, HW), jnp.float32),
                   jax.ShapeDtypeStruct((N, 8, HW), jnp.float32),
                   jax.ShapeDtypeStruct((N, 8, HW), jnp.float32)),
        grid=grid,
        in_specs=[pl.BlockSpec((None, C, tile), lambda n, s: (n, 0, s)),
                  pl.BlockSpec((PAD_OUT, C), lambda n, s: (0, 0)),
                  pl.BlockSpec((PAD_OUT, 1), lambda n, s: (0, 0)),
                  pl.BlockSpec((2, tile), lambda n, s: (0, s))],
        out_specs=(pl.BlockSpec((None, 1, tile), lambda n, s: (n, 0, s)),
                   pl.BlockSpec((None, 8, tile), lambda n, s: (n, 0, s)),
                   pl.BlockSpec((None, 8, tile), lambda n, s: (n, 0, s))),
        compiler_params=pltpu.CompilerParams(
            dimension_semantics=("parallel", "parallel")),
        cost_estimate=cost,
    )(x, wt, b, xy)

    # NCHW outputs are free reshapes in this layout (no transpose).
    cls = cls_o.reshape(N, 1, H, W)
    bbox = box_o.reshape(N, 8, H, W)

    # reg_preds needs channels-last; this transpose touches only the small
    # 8-channel decode tensor (~2% of the feature-map bytes).
    dec = jnp.transpose(dec_o, (0, 2, 1))                       # (N, HW, 8)
    # TODO(synk): atan2 has no guaranteed Pallas/Mosaic TPU lowering; applied
    # here in JAX glue on the (N, HW, 2) slice.
    rot = jnp.arctan2(dec[..., 6:7], dec[..., 7:8])
    reg_preds = jnp.concatenate([dec[..., :6], rot], axis=-1)   # (N, HW, 7)

    return {'cls_preds': cls, 'reg_preds': reg_preds, 'cls': cls,
            'bbox_preds': bbox}


def init_params(key):
    """Deterministic, shape-faithful init matching CenterPointIntermediate.init_weight."""
    k1, k2, k3 = jax.random.split(key, 3)
    pi = 0.01
    bound = 1.0 / np.sqrt(IN_CH)
    # conv_cls: weight = default torch init surrogate (uniform), bias = -log((1-pi)/pi)
    w_cls = jax.random.uniform(k1, (IN_CH, 1), jnp.float32, -bound, bound)
    b_cls = jnp.full((1,), -np.log((1.0 - pi) / pi), jnp.float32)
    # conv_box: weight ~ N(0, 0.001), bias = default torch uniform surrogate
    w_box = 0.001 * jax.random.normal(k2, (IN_CH, 8), jnp.float32)
    b_box = jax.random.uniform(k3, (8,), jnp.float32, -bound, bound)
    return {'w_cls': w_cls, 'b_cls': b_cls, 'w_box': w_box, 'b_box': b_box}


def reference_forward(feat, params, *, voxel_size, lidar_range, out_size_factor):
    """Pure-JAX reference reproducing the PyTorch head + generate_predicted_boxes."""
    N, C, H, W = feat.shape
    x = jnp.transpose(feat, (0, 2, 3, 1)).reshape(-1, C).astype(jnp.float32)
    cls_flat = x @ params['w_cls'] + params['b_cls']
    box_flat = x @ params['w_box'] + params['b_box']
    cls = cls_flat.reshape(N, H, W, 1).transpose(0, 3, 1, 2)
    bbox = box_flat.reshape(N, H, W, 8).transpose(0, 3, 1, 2)

    box_preds = box_flat.reshape(N, H * W, 8)
    reg = box_preds[..., 0:2]
    hei = box_preds[..., 2:3]
    dim = jnp.exp(box_preds[..., 3:6])
    rot = jnp.arctan2(box_preds[..., 6:7], box_preds[..., 7:8])
    ys_g, xs_g = jnp.meshgrid(jnp.arange(H), jnp.arange(W), indexing='ij')
    xs = xs_g.reshape(1, -1, 1).astype(jnp.float32) + reg[..., 0:1]
    ys = ys_g.reshape(1, -1, 1).astype(jnp.float32) + reg[..., 1:2]
    xs = xs * out_size_factor * voxel_size[0] + lidar_range[0]
    ys = ys * out_size_factor * voxel_size[1] + lidar_range[1]
    reg_preds = jnp.concatenate([xs, ys, hei, dim, rot], axis=-1)
    return {'cls_preds': cls, 'reg_preds': reg_preds, 'cls': cls,
            'bbox_preds': bbox}


if __name__ == "__main__":
    key = jax.random.PRNGKey(0)
    k_feat, k_params = jax.random.split(key)

    # Small, module-consistent shapes: backbone output has 128*3 = 384 channels.
    N, C, H, W = 2, IN_CH, 16, 16
    spatial_features_2d = jax.random.normal(k_feat, (N, C, H, W), jnp.float32)

    voxel_size = (0.4, 0.4, 4.0)
    lidar_range = (-140.8, -40.0, -3.0, 140.8, 40.0, 1.0)
    out_size_factor = 2

    params = init_params(k_params)

    out = centerpoint_head_forward(
        spatial_features_2d, params,
        voxel_size=voxel_size, lidar_range=lidar_range,
        out_size_factor=out_size_factor)
    out = jax.tree_util.tree_map(jax.block_until_ready, out)

    ref = reference_forward(
        spatial_features_2d, params,
        voxel_size=voxel_size, lidar_range=lidar_range,
        out_size_factor=out_size_factor)

    np.testing.assert_allclose(np.asarray(out['cls_preds']),
                               np.asarray(ref['cls_preds']), rtol=2e-4, atol=2e-4)
    np.testing.assert_allclose(np.asarray(out['bbox_preds']),
                               np.asarray(ref['bbox_preds']), rtol=2e-4, atol=2e-4)
    np.testing.assert_allclose(np.asarray(out['reg_preds']),
                               np.asarray(ref['reg_preds']), rtol=2e-4, atol=2e-4)

    assert out['cls_preds'].shape == (N, 1, H, W)
    assert out['bbox_preds'].shape == (N, 8, H, W)
    assert out['reg_preds'].shape == (N, H * W, 7)

    print("KERNEL_OK")
</pallas_src>

<mosaic_0001>
module attributes {stable_mosaic.version = 11 : i64} {
  func.func @_head_decode_kernel(%arg0: i32, %arg1: i32, %arg2: memref<1x384x256xf32, #tpu.memory_space<vmem>>, %arg3: memref<16x384xf32, #tpu.memory_space<vmem>>, %arg4: memref<16x1xf32, #tpu.memory_space<vmem>>, %arg5: memref<2x256xf32, #tpu.memory_space<vmem>>, %arg6: memref<1x1x256xf32, #tpu.memory_space<vmem>>, %arg7: memref<1x8x256xf32, #tpu.memory_space<vmem>>, %arg8: memref<1x8x256xf32, #tpu.memory_space<vmem>>) attributes {dimension_semantics = [#tpu.dimension_semantics<parallel>, #tpu.dimension_semantics<parallel>], iteration_bounds = array<i64: 2, 1>, scalar_prefetch = 0 : i64, scratch_operands = 0 : i64, tpu.core_type = #tpu.core_type<tc>, window_params = [{transform_indices = @transform_0, window_bounds = array<i64: 1, 384, 256>}, {pipeline_mode = #tpu.pipeline_mode<synchronous>, transform_indices = @transform_1, window_bounds = array<i64: 16, 384>}, {pipeline_mode = #tpu.pipeline_mode<synchronous>, transform_indices = @transform_2, window_bounds = array<i64: 16, 1>}, {transform_indices = @transform_3, window_bounds = array<i64: 2, 256>}, {transform_indices = @transform_4, window_bounds = array<i64: 1, 1, 256>}, {transform_indices = @transform_5, window_bounds = array<i64: 1, 8, 256>}, {transform_indices = @transform_6, window_bounds = array<i64: 1, 8, 256>}]} {
    %c0 = arith.constant 0 : index
    %c0_0 = arith.constant 0 : index
    %c0_1 = arith.constant 0 : index
    %0 = vector.load %arg2[%c0, %c0_0, %c0_1] : memref<1x384x256xf32, #tpu.memory_space<vmem>>, vector<1x384x256xf32>
    %1 = vector.shape_cast %0 : vector<1x384x256xf32> to vector<384x256xf32>
    %c0_2 = arith.constant 0 : index
    %c0_3 = arith.constant 0 : index
    %2 = vector.load %arg3[%c0_2, %c0_3] : memref<16x384xf32, #tpu.memory_space<vmem>>, vector<16x384xf32>
    %c0_4 = arith.constant 0 : index
    %c0_5 = arith.constant 0 : index
    %3 = vector.load %arg4[%c0_4, %c0_5] : memref<16x1xf32, #tpu.memory_space<vmem>>, vector<16x1xf32>
    %cst = arith.constant dense<0.000000e+00> : vector<16x256xf32>
    %4 = tpu.matmul %2, %1, %cst {dimension_numbers = #tpu.dot_dimension_numbers<[1], [0], [0], [1], [0, 0, 1, 1], [], []>} : vector<16x384xf32>, vector<384x256xf32>, vector<16x256xf32> -> vector<16x256xf32>
    %5 = vector.broadcast %3 : vector<16x1xf32> to vector<16x256xf32>
    %6 = arith.addf %4, %5 : vector<16x256xf32>
    %7 = vector.extract_strided_slice %6 {offsets = [0, 0], sizes = [1, 256], strides = [1, 1]} : vector<16x256xf32> to vector<1x256xf32>
    %c0_6 = arith.constant 0 : index
    %c0_7 = arith.constant 0 : index
    %c0_8 = arith.constant 0 : index
    %8 = vector.load %arg6[%c0_6, %c0_7, %c0_8] : memref<1x1x256xf32, #tpu.memory_space<vmem>>, vector<1x1x256xf32>
    %9 = vector.shape_cast %8 : vector<1x1x256xf32> to vector<1x256xf32>
    %10 = vector.shape_cast %7 : vector<1x256xf32> to vector<1x1x256xf32>
    tpu.vector_store %arg6[%c0_6, %c0_7, %c0_8], %10 {strides = array<i32>} : memref<1x1x256xf32, #tpu.memory_space<vmem>>, vector<1x1x256xf32>,
    %11 = vector.extract_strided_slice %6 {offsets = [1, 0], sizes = [8, 256], strides = [1, 1]} : vector<16x256xf32> to vector<8x256xf32>
    %c0_9 = arith.constant 0 : index
    %c0_10 = arith.constant 0 : index
    %c0_11 = arith.constant 0 : index
    %12 = vector.load %arg7[%c0_9, %c0_10, %c0_11] : memref<1x8x256xf32, #tpu.memory_space<vmem>>, vector<1x8x256xf32>
    %13 = vector.shape_cast %12 : vector<1x8x256xf32> to vector<8x256xf32>
    %14 = vector.shape_cast %11 : vector<8x256xf32> to vector<1x8x256xf32>
    tpu.vector_store %arg7[%c0_9, %c0_10, %c0_11], %14 {strides = array<i32>} : memref<1x8x256xf32, #tpu.memory_space<vmem>>, vector<1x8x256xf32>,
    %c0_12 = arith.constant 0 : index
    %c0_13 = arith.constant 0 : index
    %15 = vector.load %arg5[%c0_12, %c0_13] : memref<2x256xf32, #tpu.memory_space<vmem>>, vector<2x256xf32>
    %16 = vector.extract_strided_slice %15 {offsets = [0, 0], sizes = [1, 256], strides = [1, 1]} : vector<2x256xf32> to vector<1x256xf32>
    %17 = vector.extract_strided_slice %11 {offsets = [0, 0], sizes = [1, 256], strides = [1, 1]} : vector<8x256xf32> to vector<1x256xf32>
    %18 = arith.addf %16, %17 : vector<1x256xf32>
    %cst_14 = arith.constant 8.000000e-01 : f32
    %19 = vector.broadcast %cst_14 : f32 to vector<1x256xf32>
    %20 = arith.mulf %18, %19 : vector<1x256xf32>
    %cst_15 = arith.constant -1.408000e+02 : f32
    %21 = vector.broadcast %cst_15 : f32 to vector<1x256xf32>
    %22 = arith.addf %20, %21 : vector<1x256xf32>
    %23 = vector.extract_strided_slice %15 {offsets = [1, 0], sizes = [1, 256], strides = [1, 1]} : vector<2x256xf32> to vector<1x256xf32>
    %24 = vector.extract_strided_slice %11 {offsets = [1, 0], sizes = [1, 256], strides = [1, 1]} : vector<8x256xf32> to vector<1x256xf32>
    %25 = arith.addf %23, %24 : vector<1x256xf32>
    %cst_16 = arith.constant 8.000000e-01 : f32
    %26 = vector.broadcast %cst_16 : f32 to vector<1x256xf32>
    %27 = arith.mulf %25, %26 : vector<1x256xf32>
    %cst_17 = arith.constant -4.000000e+01 : f32
    %28 = vector.broadcast %cst_17 : f32 to vector<1x256xf32>
    %29 = arith.addf %27, %28 : vector<1x256xf32>
    %30 = vector.extract_strided_slice %11 {offsets = [2, 0], sizes = [1, 256], strides = [1, 1]} : vector<8x256xf32> to vector<1x256xf32>
    %31 = vector.extract_strided_slice %11 {offsets = [3, 0], sizes = [3, 256], strides = [1, 1]} : vector<8x256xf32> to vector<3x256xf32>
    %32 = math.exp %31 : vector<3x256xf32>
    %33 = vector.extract_strided_slice %11 {offsets = [6, 0], sizes = [2, 256], strides = [1, 1]} : vector<8x256xf32> to vector<2x256xf32>
    %34 = tpu.concatenate %22, %29, %30, %32, %33 in 0 : vector<1x256xf32>, vector<1x256xf32>, vector<1x256xf32>, vector<3x256xf32>, vector<2x256xf32> -> vector<8x256xf32>
    %c0_18 = arith.constant 0 : index
    %c0_19 = arith.constant 0 : index
    %c0_20 = arith.constant 0 : index
    %35 = vector.load %arg8[%c0_18, %c0_19, %c0_20] : memref<1x8x256xf32, #tpu.memory_space<vmem>>, vector<1x8x256xf32>
    %36 = vector.shape_cast %35 : vector<1x8x256xf32> to vector<8x256xf32>
    %37 = vector.shape_cast %34 : vector<8x256xf32> to vector<1x8x256xf32>
    tpu.vector_store %arg8[%c0_18, %c0_19, %c0_20], %37 {strides = array<i32>} : memref<1x8x256xf32, #tpu.memory_space<vmem>>, vector<1x8x256xf32>,
    return
  }
  func.func @transform_0(%arg0: i32, %arg1: i32) -> (i32, i32, i32) {
    %c0_i32 = arith.constant 0 : i32
    %c0_i32_0 = arith.constant 0 : i32
    return %arg0, %c0_i32, %arg1 : i32, i32, i32
  }
  func.func @transform_1(%arg0: i32, %arg1: i32) -> (i32, i32) {
    %c0_i32 = arith.constant 0 : i32
    %c0_i32_0 = arith.constant 0 : i32
    %c0_i32_1 = arith.constant 0 : i32
    return %c0_i32, %c0_i32_0 : i32, i32
  }
  func.func @transform_2(%arg0: i32, %arg1: i32) -> (i32, i32) {
    %c0_i32 = arith.constant 0 : i32
    %c0_i32_0 = arith.constant 0 : i32
    %c0_i32_1 = arith.constant 0 : i32
    return %c0_i32, %c0_i32_0 : i32, i32
  }
  func.func @transform_3(%arg0: i32, %arg1: i32) -> (i32, i32) {
    %c0_i32 = arith.constant 0 : i32
    %c0_i32_0 = arith.constant 0 : i32
    return %c0_i32, %arg1 : i32, i32
  }
  func.func @transform_4(%arg0: i32, %arg1: i32) -> (i32, i32, i32) {
    %c0_i32 = arith.constant 0 : i32
    %c0_i32_0 = arith.constant 0 : i32
    return %arg0, %c0_i32, %arg1 : i32, i32, i32
  }
  func.func @transform_5(%arg0: i32, %arg1: i32) -> (i32, i32, i32) {
    %c0_i32 = arith.constant 0 : i32
    %c0_i32_0 = arith.constant 0 : i32
    return %arg0, %c0_i32, %arg1 : i32, i32, i32
  }
  func.func @transform_6(%arg0: i32, %arg1: i32) -> (i32, i32, i32) {
    %c0_i32 = arith.constant 0 : i32
    %c0_i32_0 = arith.constant 0 : i32
    return %arg0, %c0_i32, %arg1 : i32, i32, i32
  }
}

</mosaic_0001>

<bundles_post_ra>
// kernel: centerpoint_head_forward.1
= control target key start
LH: loop header
LB: loop body
LE: loop exit
PB: predicated region body
PF: predicated region fallthrough
CT: control target
= control target key end

     0   :  { %s1144_s21 = smov 0   ;;  %s1146_s22 = smov 0   ;;  %s1332_s0 = inlined_call_operand.vmem [shape: f32[2,384,256], index: 0, kind: input, shape index: {}]   ;;  %s1333_s1 = inlined_call_operand.vmem [shape: f32[16,384], index: 1, kind: input, shape index: {}]   ;;  %s1334_s2 = inlined_call_operand.vmem [shape: f32[16,1], index: 2, kind: input, shape index: {}]   ;;  %s1335_s3 = inlined_call_operand.vmem [shape: f32[2,256], index: 3, kind: input, shape index: {}]   ;;  %s1336_s4 = inlined_call_operand.vmem [shape: f32[2,1,256], index: 4, kind: output, shape index: {0}]   ;;  %s1337_s5 = inlined_call_operand.vmem [shape: f32[2,8,256], index: 5, kind: output, shape index: {1}]   ;;  %s1338_s6 = inlined_call_operand.vmem [shape: f32[2,8,256], index: 6, kind: output, shape index: {2}]  }
   0x1   :  { %s1148_s23 = smov 0  }
   0x2 LB: > { %s29_s24 = sadd.s32 1, %s1099_s22  ;;  %p931_p0 = scmp.ge.s32.totalorder %s1103_s23, 1  ;;  %s1103_s23 = sphi %s1148_s23, %s17_s23   ;;  %s1099_s22 = sphi %s1146_s22, %s1342_s22   ;;  %s1095_s21 = sphi %s1144_s21, %s1341_s21  }
   0x3   : > { %p31_p1 = scmp.ge.s32.totalorder %s29_s24, 2  ;;  %p253_p2 = scmp.lt.s32.totalorder %s1103_s23, 3 }
   0x5   : > { %s1344_s24 = smov (%p31_p1, %s29_s24), 0  ;;  %p254_p3 = pnand %p931_p0, %p253_p2 }
   0x6   : > { %p314_p4 = scmp.lt.s32.totalorder (!%p254_p3), %s1095_s21, 1  ;;  %v455_v0 = vld [vmem:[%s1333_s1 + $0x8] sm:$0xff] (!%p254_p3)  ;;  %v1105_v1 = vmov (!%p254_p3), 0.0   ;;  %v1106_v2 = vmov (!%p254_p3), 0   ;;  %v460_v3 = vld [vmem:[%s1334_s2] sm:$0xff] (!%p254_p3)  ;;  %vm651_vm1 = vcmask (!%p254_p3), 1046528  }
   0x7   : > { %257 = sbr.rel (%p254_p3) target bundleno = 323 (0x143), region = 36  ;;  %536 = vmatprep.mubr.f32.mxu1 (!%p254_p3), %v455_v0  ;;  %613 = vmatprep.mubr.f32.mxu0 (!%p254_p3), %v1105_v1  ;;  %v461_v4 = vld [vmem:[%s1334_s2 + $0x8] sm:$0xff] (!%p254_p3)  ;;  %vm716_vm2 = vcmask (!%p254_p3), 1040384   ;;  %vm719_vm3 = vcmask (!%p254_p3), 1041408   ;;  %vm722_vm4 = vcmask (!%p254_p3), 1042432   ;;  %vm725_vm5 = vcmask (!%p254_p3), 1045504  }
   0x8   : > { %1076 = vset.pattern.permute.xlu0 (!%p254_p3), %v1106_v2 }
   0x9   : > { %464 = vperm.xlu0 (!%p254_p3), %1076, %v460_v3  }
   0xd   : > { %469 = vperm.xlu0 (!%p254_p3), %1076, %v461_v4  }
   0xe   : > { %s1346_s21 = smov (!%p314_p4, %s1095_s21), 1 }
   0xf   : > { %s1047_s29 = smul.u32 768, %s1346_s21  ;;  %s933_s25 = sshll.u32 %s1346_s21, 1 }
  0x10   : > { %s941_s26 = sshll.u32 %s1346_s21, 4 }
  0x11   : > { %s1178_s10 = scalar_lea.vmem %s1332_s0, %s1047_s29  ;;  %s336_s29 = scalar_lea.vmem %s1336_s4, %s933_s25 }
  0x12   : > { %v359_v5 = vld [vmem:[%s1178_s10 + $0x8] sm:$0xff]  ;;  %v361_v6 = vld [vmem:[%s1178_s10 + $0x18] sm:$0xff]  ;;  %v358_v7 = vld [vmem:[%s1178_s10] sm:$0xff]  ;;  %s356_s13 = scalar_lea.vmem %s1338_s6, %s941_s26 }
  0x13   : > { %v943_v8 = vpack.c.bf16 %v361_v6, %v359_v5  ;;  %v360_v9 = vld [vmem:[%s1178_s10 + $0x10] sm:$0xff]  ;;  %v363_v10 = vld [vmem:[%s1178_s10 + $0x28] sm:$0xff]  ;;  %v365_v11 = vld [vmem:[%s1178_s10 + $0x38] sm:$0xff] }
  0x14   : > { %v945_v12 = vpack.c.bf16 %v360_v9, %v358_v7  ;;  %v947_v13 = vpack.c.bf16 %v365_v11, %v363_v10  ;;  %v362_v14 = vld [vmem:[%s1178_s10 + $0x20] sm:$0xff]  ;;  %v364_v15 = vld [vmem:[%s1178_s10 + $0x30] sm:$0xff]  ;;  %v367_v16 = vld [vmem:[%s1178_s10 + $0x48] sm:$0xff] }
  0x15   : > { %944 = vmatprep.subr.bf16.mxu1 %v943_v8  ;;  %v369_v17 = vld [vmem:[%s1178_s10 + $0x58] sm:$0xff]  ;;  %v949_v18 = vpack.c.bf16 %v364_v15, %v362_v14  ;;  %v366_v20 = vld [vmem:[%s1178_s10 + $0x40] sm:$0xff]  ;;  %v368_v21 = vld [vmem:[%s1178_s10 + $0x50] sm:$0xff] }
  0x16   : > { %946 = vmatpush1.bf16.msra.mxu1 %v945_v12  ;;  %v951_v19 = vpack.c.bf16 %v369_v17, %v367_v16  ;;  %v371_v22 = vld [vmem:[%s1178_s10 + $0x68] sm:$0xff]  ;;  %v373_v23 = vld [vmem:[%s1178_s10 + $0x78] sm:$0xff]  ;;  %v953_v24 = vpack.c.bf16 %v368_v21, %v366_v20  ;;  %v370_v26 = vld [vmem:[%s1178_s10 + $0x60] sm:$0xff] }
  0x17   : > { %948 = vmatprep.subr.bf16.mxu1 %v947_v13  ;;  %v955_v25 = vpack.c.bf16 %v373_v23, %v371_v22  ;;  %v372_v27 = vld [vmem:[%s1178_s10 + $0x70] sm:$0xff]  ;;  %v375_v28 = vld [vmem:[%s1178_s10 + $0x88] sm:$0xff]  ;;  %v377_v29 = vld [vmem:[%s1178_s10 + $0x98] sm:$0xff] }
  0x18   : > { %v957_v30 = vpack.c.bf16 %v372_v27, %v370_v26  ;;  %v423_v31 = vld [vmem:[%s1178_s10 + $0x208] sm:$0xff]  ;;  %v425_v32 = vld [vmem:[%s1178_s10 + $0x218] sm:$0xff]  ;;  %v422_v33 = vld [vmem:[%s1178_s10 + $0x200] sm:$0xff]  ;;  %v959_v34 = vpack.c.bf16 %v377_v29, %v375_v28 }
  0x19   : > { %v374_v35 = vld [vmem:[%s1178_s10 + $0x80] sm:$0xff]  ;;  %v376_v36 = vld [vmem:[%s1178_s10 + $0x90] sm:$0xff]  ;;  %v1007_v37 = vpack.c.bf16 %v425_v32, %v423_v31  ;;  %v379_v39 = vld [vmem:[%s1178_s10 + $0xa8] sm:$0xff] }
  0x1a   : > { %950 = vmatpush1.bf16.msra.mxu1 %v949_v18  ;;  %v424_v38 = vld [vmem:[%s1178_s10 + $0x210] sm:$0xff]  ;;  %v381_v40 = vld [vmem:[%s1178_s10 + $0xb8] sm:$0xff]  ;;  %v427_v42 = vld [vmem:[%s1178_s10 + $0x228] sm:$0xff]  ;;  %v961_v46 = vpack.c.bf16 %v376_v36, %v374_v35 }
  0x1b   : > { %952 = vmatprep.subr.bf16.mxu1 %v951_v19  ;;  %v1009_v41 = vpack.c.bf16 %v424_v38, %v422_v33  ;;  %1008 = vmatprep.subr.bf16.mxu0 %v1007_v37  ;;  %v429_v43 = vld [vmem:[%s1178_s10 + $0x238] sm:$0xff]  ;;  %v426_v44 = vld [vmem:[%s1178_s10 + $0x220] sm:$0xff]  ;;  %v428_v45 = vld [vmem:[%s1178_s10 + $0x230] sm:$0xff]  ;;  %v963_v51 = vpack.c.bf16 %v381_v40, %v379_v39 }
  0x1c   : > { %v378_v47 = vld [vmem:[%s1178_s10 + $0xa0] sm:$0xff]  ;;  %v380_v48 = vld [vmem:[%s1178_s10 + $0xb0] sm:$0xff]  ;;  %v1011_v49 = vpack.c.bf16 %v429_v43, %v427_v42  ;;  %v1013_v50 = vpack.c.bf16 %v428_v45, %v426_v44  ;;  %v383_v52 = vld [vmem:[%s1178_s10 + $0xc8] sm:$0xff] }
  0x1d   : > { %1010 = vmatpush1.bf16.msra.mxu0 %v1009_v41  ;;  %v431_v53 = vld [vmem:[%s1178_s10 + $0x248] sm:$0xff]  ;;  %v433_v54 = vld [vmem:[%s1178_s10 + $0x258] sm:$0xff]  ;;  %v430_v57 = vld [vmem:[%s1178_s10 + $0x240] sm:$0xff]  ;;  %v965_v59 = vpack.c.bf16 %v380_v48, %v378_v47 }
  0x1e   : > { %954 = vmatpush1.bf16.msra.mxu1 %v953_v24  ;;  %v385_v55 = vld [vmem:[%s1178_s10 + $0xd8] sm:$0xff]  ;;  %1012 = vmatprep.subr.bf16.mxu0 %v1011_v49  ;;  %v1015_v56 = vpack.c.bf16 %v433_v54, %v431_v53  ;;  %v432_v58 = vld [vmem:[%s1178_s10 + $0x250] sm:$0xff]  ;;  %v382_v60 = vld [vmem:[%s1178_s10 + $0xc0] sm:$0xff] }
  0x1f   : > { %956 = vmatprep.subr.bf16.mxu1 %v955_v25  ;;  %v1017_v61 = vpack.c.bf16 %v432_v58, %v430_v57  ;;  %v435_v62 = vld [vmem:[%s1178_s10 + $0x268] sm:$0xff]  ;;  %v437_v63 = vld [vmem:[%s1178_s10 + $0x278] sm:$0xff]  ;;  %v967_v0 = vpack.c.bf16 %v385_v55, %v383_v52  ;;  %v384_v2 = vld [vmem:[%s1178_s10 + $0xd0] sm:$0xff] }
  0x20   : > { %v1019_v3 = vpack.c.bf16 %v437_v63, %v435_v62  ;;  %v434_v4 = vld [vmem:[%s1178_s10 + $0x260] sm:$0xff]  ;;  %v436_v5 = vld [vmem:[%s1178_s10 + $0x270] sm:$0xff]  ;;  %v387_v6 = vld [vmem:[%s1178_s10 + $0xe8] sm:$0xff]  ;;  %v969_v10 = vpack.c.bf16 %v384_v2, %v382_v60 }
  0x21   : > { %1014 = vmatpush1.bf16.msra.mxu0 %v1013_v50  ;;  %v389_v7 = vld [vmem:[%s1178_s10 + $0xf8] sm:$0xff]  ;;  %v439_v8 = vld [vmem:[%s1178_s10 + $0x288] sm:$0xff]  ;;  %v386_v11 = vld [vmem:[%s1178_s10 + $0xe0] sm:$0xff]  ;;  %v1021_v13 = vpack.c.bf16 %v436_v5, %v434_v4 }
  0x22   : > { %958 = vmatpush1.bf16.msra.mxu1 %v957_v30  ;;  %1016 = vmatprep.subr.bf16.mxu0 %v1015_v56  ;;  %v441_v9 = vld [vmem:[%s1178_s10 + $0x298] sm:$0xff]  ;;  %v388_v12 = vld [vmem:[%s1178_s10 + $0xf0] sm:$0xff]  ;;  %v971_v14 = vpack.c.bf16 %v389_v7, %v387_v6  ;;  %v391_v15 = vld [vmem:[%s1178_s10 + $0x108] sm:$0xff] }
  0x23   : > { %960 = vmatprep.subr.bf16.mxu1 %v959_v34  ;;  %v1023_v16 = vpack.c.bf16 %v441_v9, %v439_v8  ;;  %v438_v17 = vld [vmem:[%s1178_s10 + $0x280] sm:$0xff]  ;;  %v440_v18 = vld [vmem:[%s1178_s10 + $0x290] sm:$0xff]  ;;  %v393_v19 = vld [vmem:[%s1178_s10 + $0x118] sm:$0xff]  ;;  %v973_v22 = vpack.c.bf16 %v388_v12, %v386_v11 }
  0x24   : > { %v443_v20 = vld [vmem:[%s1178_s10 + $0x2a8] sm:$0xff]  ;;  %v445_v21 = vld [vmem:[%s1178_s10 + $0x2b8] sm:$0xff]  ;;  %v390_v23 = vld [vmem:[%s1178_s10 + $0x100] sm:$0xff]  ;;  %v1025_v25 = vpack.c.bf16 %v440_v18, %v438_v17  ;;  %v975_v26 = vpack.c.bf16 %v393_v19, %v391_v15 }
  0x25   : > { %1018 = vmatpush1.bf16.msra.mxu0 %v1017_v61  ;;  %v392_v24 = vld [vmem:[%s1178_s10 + $0x110] sm:$0xff]  ;;  %v395_v27 = vld [vmem:[%s1178_s10 + $0x128] sm:$0xff]  ;;  %v1027_v28 = vpack.c.bf16 %v445_v21, %v443_v20  ;;  %v442_v29 = vld [vmem:[%s1178_s10 + $0x2a0] sm:$0xff] }
  0x26   : > { %962 = vmatpush1.bf16.msra.mxu1 %v961_v46  ;;  %1020 = vmatprep.subr.bf16.mxu0 %v1019_v3  ;;  %v444_v30 = vld [vmem:[%s1178_s10 + $0x2b0] sm:$0xff]  ;;  %v397_v31 = vld [vmem:[%s1178_s10 + $0x138] sm:$0xff]  ;;  %v447_v32 = vld [vmem:[%s1178_s10 + $0x2c8] sm:$0xff]  ;;  %v977_v34 = vpack.c.bf16 %v392_v24, %v390_v23 }
  0x27   : > { %964 = vmatprep.subr.bf16.mxu1 %v963_v51  ;;  %v449_v33 = vld [vmem:[%s1178_s10 + $0x2d8] sm:$0xff]  ;;  %v394_v35 = vld [vmem:[%s1178_s10 + $0x120] sm:$0xff]  ;;  %v396_v36 = vld [vmem:[%s1178_s10 + $0x130] sm:$0xff]  ;;  %v1029_v37 = vpack.c.bf16 %v444_v30, %v442_v29  ;;  %v979_v38 = vpack.c.bf16 %v397_v31, %v395_v27  ;;  %v1107_v31 = vmov 1966171168  }
  0x28   : > { %v399_v39 = vld [vmem:[%s1178_s10 + $0x148] sm:$0xff]  ;;  %v1031_v40 = vpack.c.bf16 %v449_v33, %v447_v32  ;;  %v446_v41 = vld [vmem:[%s1178_s10 + $0x2c0] sm:$0xff]  ;;  %v448_v42 = vld [vmem:[%s1178_s10 + $0x2d0] sm:$0xff]  ;;  %v981_v46 = vpack.c.bf16 %v396_v36, %v394_v35  ;;  %v630_v32 = vunpack.c.l.s4 %v1107_v31  ;;  %v632_v33 = vlaneseq }
  0x29   : > { %1022 = vmatpush1.bf16.msra.mxu0 %v1021_v13  ;;  %v401_v43 = vld [vmem:[%s1178_s10 + $0x158] sm:$0xff]  ;;  %v451_v44 = vld [vmem:[%s1178_s10 + $0x2e8] sm:$0xff]  ;;  %v398_v47 = vld [vmem:[%s1178_s10 + $0x140] sm:$0xff]  ;;  %v1033_v48 = vpack.c.bf16 %v448_v42, %v446_v41 }
  0x2a   : > { %966 = vmatpush1.bf16.msra.mxu1 %v965_v59  ;;  %1024 = vmatprep.subr.bf16.mxu0 %v1023_v16  ;;  %v453_v45 = vld [vmem:[%s1178_s10 + $0x2f8] sm:$0xff]  ;;  %v983_v49 = vpack.c.bf16 %v401_v43, %v399_v39  ;;  %v400_v50 = vld [vmem:[%s1178_s10 + $0x150] sm:$0xff]  ;;  %v450_v52 = vld [vmem:[%s1178_s10 + $0x2e0] sm:$0xff]  ;;  %v633_v39 = vshrl.u32 %v632_v33, 7  ;;  %vm1298_vm0 = vcmp.lt.s32.totalorder %v632_v33, 256 }
  0x2b   : > { %968 = vmatprep.subr.bf16.mxu1 %v967_v0  ;;  %v1035_v51 = vpack.c.bf16 %v453_v45, %v451_v44  ;;  %v452_v53 = vld [vmem:[%s1178_s10 + $0x2f0] sm:$0xff]  ;;  %v403_v54 = vld [vmem:[%s1178_s10 + $0x168] sm:$0xff]  ;;  %v405_v55 = vld [vmem:[%s1178_s10 + $0x178] sm:$0xff]  ;;  %v985_v56 = vpack.c.bf16 %v400_v50, %v398_v47 }
  0x2c   : > { %v1037_v57 = vpack.c.bf16 %v452_v53, %v450_v52  ;;  %v987_v58 = vpack.c.bf16 %v405_v55, %v403_v54  ;;  %v402_v59 = vld [vmem:[%s1178_s10 + $0x160] sm:$0xff]  ;;  %v404_v60 = vld [vmem:[%s1178_s10 + $0x170] sm:$0xff]  ;;  %v407_v61 = vld [vmem:[%s1178_s10 + $0x188] sm:$0xff] }
  0x2d   : > { %1026 = vmatpush1.bf16.msra.mxu0 %v1025_v25  ;;  %v409_v62 = vld [vmem:[%s1178_s10 + $0x198] sm:$0xff]  ;;  %v989_v63 = vpack.c.bf16 %v404_v60, %v402_v59  ;;  %v456_v0 = vld [vmem:[%s1333_s1 + $0x10] sm:$0xff]  ;;  %v406_v3 = vld [vmem:[%s1178_s10 + $0x180] sm:$0xff] }
  0x2e   : > { %970 = vmatpush1.bf16.msra.mxu1 %v969_v10  ;;  %1028 = vmatprep.subr.bf16.mxu0 %v1027_v28  ;;  %v991_v2 = vpack.c.bf16 %v409_v62, %v407_v61  ;;  %v408_v4 = vld [vmem:[%s1178_s10 + $0x190] sm:$0xff]  ;;  %v411_v5 = vld [vmem:[%s1178_s10 + $0x1a8] sm:$0xff]  ;;  %v413_v6 = vld [vmem:[%s1178_s10 + $0x1b8] sm:$0xff] }
  0x2f   : > { %972 = vmatprep.subr.bf16.mxu1 %v971_v14  ;;  %v993_v7 = vpack.c.bf16 %v408_v4, %v406_v3  ;;  %v459_v8 = vld [vmem:[%s1333_s1 + $0x28] sm:$0xff]  ;;  %v995_v9 = vpack.c.bf16 %v413_v6, %v411_v5  ;;  %v410_v10 = vld [vmem:[%s1178_s10 + $0x1a0] sm:$0xff]  ;;  %v412_v11 = vld [vmem:[%s1178_s10 + $0x1b0] sm:$0xff] }
  0x30   : > { %v415_v12 = vld [vmem:[%s1178_s10 + $0x1c8] sm:$0xff]  ;;  %v417_v13 = vld [vmem:[%s1178_s10 + $0x1d8] sm:$0xff]  ;;  %v997_v14 = vpack.c.bf16 %v412_v11, %v410_v10  ;;  %v414_v16 = vld [vmem:[%s1178_s10 + $0x1c0] sm:$0xff] }
  0x31   : > { %1030 = vmatpush1.bf16.msra.mxu0 %v1029_v37  ;;  %v999_v15 = vpack.c.bf16 %v417_v13, %v415_v12  ;;  %v419_v17 = vld [vmem:[%s1178_s10 + $0x1e8] sm:$0xff]  ;;  %v421_v18 = vld [vmem:[%s1178_s10 + $0x1f8] sm:$0xff]  ;;  %v418_v21 = vld [vmem:[%s1178_s10 + $0x1e0] sm:$0xff]  ;;  %v689_v12 = vsub.s32 0, %v633_v39  ;;  %v693_v13 = vsub.s32 2, %v633_v39 }
  0x32   : > { %974 = vmatpush1.bf16.msra.mxu1 %v973_v22  ;;  %1032 = vmatprep.subr.bf16.mxu0 %v1031_v40  ;;  %v1003_v20 = vpack.c.bf16 %v421_v18, %v419_v17  ;;  %v420_v22 = vld [vmem:[%s1178_s10 + $0x1f0] sm:$0xff]  ;;  %v454_v24 = vld [vmem:[%s1333_s1] sm:$0xff] }
  0x33   : > { %976 = vmatprep.subr.bf16.mxu1 %v975_v26  ;;  %v1005_v23 = vpack.c.bf16 %v420_v22, %v418_v21  ;;  %v458_v25 = vld [vmem:[%s1333_s1 + $0x20] sm:$0xff]  ;;  %v457_v26 = vld [vmem:[%s1333_s1 + $0x18] sm:$0xff] }
  0x35   : > { %1034 = vmatpush1.bf16.msra.mxu0 %v1033_v48 }
  0x36   : > { %978 = vmatpush1.bf16.msra.mxu1 %v977_v34  ;;  %1036 = vmatprep.subr.bf16.mxu0 %v1035_v51  ;;  %v1108_v34 = vmov 1983009808  }
  0x37   : > { %980 = vmatprep.subr.bf16.mxu1 %v979_v38  ;;  %v664_v35 = vunpack.c.l.s4 %v1108_v34  ;;  %v631_v38 = vunpack.c.0.s8 %v630_v32 }
  0x39   : > { %1038 = vmatpush1.bf16.msra.mxu0 %v1037_v57  ;;  %v665_v40 = vunpack.c.0.s8 %v664_v35  ;;  %v634_v47 = vsub.s32 %v631_v38, %v633_v39 }
  0x3a   : > { %982 = vmatpush1.bf16.msra.mxu1 %v981_v46 }
  0x3b   : > { %984 = vmatprep.subr.bf16.mxu1 %v983_v49  ;;  %v668_v48 = vsub.s32 %v665_v40, %v633_v39 }
  0x3c   : > { %614 = vmatmul.mubr.f32.vlgmr.msra.gmra.mrb[0].mxu0 %v456_v0 }
  0x3d   : > { %619 = vmatprep.mubr.f32.mxu0 %v1105_v1  ;;  %v416_v1 = vld [vmem:[%s1178_s10 + $0x1d0] sm:$0xff]  ;;  %s346_s10 = scalar_lea.vmem %s1337_s5, %s941_s26 }
  0x3e   : > { %986 = vmatpush1.bf16.msra.mxu1 %v985_v56  ;;  %v1001_v19 = vpack.c.bf16 %v416_v1, %v414_v16  ;;  %v700_v16 = vsub.s32 1, %v633_v39  ;;  %v704_v1 = vsub.s32 3, %v633_v39 }
  0x3f   : > { %988 = vmatprep.subr.bf16.mxu1 %v987_v58 }
  0x40   : > { %620 = vmatmul.mubr.f32.gmra.mrb[2].mxu0 %v459_v8 }
  0x42   : > { %990 = vmatpush1.bf16.msra.mxu1 %v989_v63  ;;  %v662_v63 = vld [vmem:[%s1335_s3] sm:$0xf] }
  0x43   : > { %992 = vmatprep.subr.bf16.mxu1 %v991_v2 }
  0x46   : > { %994 = vmatpush1.bf16.msra.mxu1 %v993_v7 }
  0x47   : > { %996 = vmatprep.subr.bf16.mxu1 %v995_v9 }
  0x4a   : > { %998 = vmatpush1.bf16.msra.mxu1 %v997_v14 }
  0x4b   : > { %1000 = vmatprep.subr.bf16.mxu1 %v999_v15 }
  0x4e   : > { %1002 = vmatpush1.bf16.msra.mxu1 %v1001_v19 }
  0x4f   : > { %1004 = vmatprep.subr.bf16.mxu1 %v1003_v20 }
  0x52   : > { %1006 = vmatpush1.bf16.msra.mxu1 %v1005_v23 }
  0x55   : > { %537 = vmatmul.mubr.f32.vlgmr.msra.gmra.mrb[0].mxu1 %v454_v24 }
  0x56   : > { %542 = vmatprep.mubr.f32.mxu1 %v458_v25 }
  0x59   : > { %543 = vmatmul.mubr.f32.gmra.mrb[2].mxu1 %v457_v26 }
  0x88   : > { %v465_v36 = vpop.permute.xlu0 %464 }
  0x8c   : > { %v470_v45 = vpop.permute.xlu0 %469 }
 0x10f   : > { %v615_v27 = vpop.f32.mrb[0].mxu0 }
 0x110   : > { %v617_v28 = vpop.f32.mrb[1].mxu0 }
 0x113   : > { %v621_v29 = vpop.f32.mrb[2].mxu0 }
 0x114   : > { %v623_v30 = vpop.f32.mrb[3].mxu0 }
 0x128   : > { %v538_v37 = vpop.f32.mrb[0].mxu1 }
 0x129   : > { %v539_v41 = vadd.f32 %v538_v37, %v465_v36  ;;  %v540_v42 = vpop.f32.mrb[1].mxu1 }
 0x12a   : > { %v541_v43 = vadd.f32 %v540_v42, %v465_v36 }
 0x12b   : > { %v1292_v44 = vadd.f32 %v615_v27, %v539_v41 }
 0x12c   : > { %v618_v46 = vadd.f32 %v617_v28, %v541_v43  ;;  %v544_v49 = vpop.f32.mrb[2].mxu1 }
 0x12d   : > { %v682_v50 = vmul.f32 1.442695, %v1292_v44  ;;  %v545_v51 = vadd.f32 %v544_v49, %v470_v45  ;;  %v546_v52 = vpop.f32.mrb[3].mxu1  ;;  %v652_v61 = vrot.slane %v1292_v44, 1 }
 0x12e   : > { %v628_v53 = vcombine.low %v1292_v44, %v618_v46  ;;  %v684_v54 = vmul.f32 1.442695, %v618_v46  ;;  %v547_v55 = vadd.f32 %v546_v52, %v470_v45  ;;  %v655_v62 = vrot.slane %v618_v46, 1 }
 0x12f   : > { %v622_v57 = vadd.f32 %v621_v29, %v545_v51  ;;  %1077 = vpow2.f32 %v682_v50 }
 0x130   : > { %v635_v58 = vrot.slane %v628_v53, %v634_v47  ;;  %v669_v59 = vrot.slane %v628_v53, %v668_v48  ;;  %v624_v60 = vadd.f32 %v623_v30, %v547_v55  ;;  %1079 = vpow2.f32 %v684_v54 }
 0x131   : > { %v653_v0 = vrot.slane %v622_v57, 1 }
 0x132   : > { %v642_v2 = vrot.slane %v635_v58, %v634_v47  ;;  %v938_v3 = vrot.slane %v669_v59, 9  ;;  %v676_v4 = vcombine.high %v669_v59, %v669_v59  ;;  %v656_v5 = vrot.slane %v624_v60, 1 }
 0x133   : > { %v654_v6 = vsel %vm651_vm1, %v652_v61, %v653_v0 }
 0x134   : > { %648 = vst.msk [vmem:[%s336_s29] sm:$0x3] %vm1298_vm0, %v642_v2  ;;  %v673_v7 = vadd.f32 %v938_v3, %v662_v63  ;;  %v677_v8 = vrot.slane %v676_v4, 7  ;;  %660 = vst [vmem:[%s346_s10] sm:$0xff] %v654_v6  ;;  %v657_v9 = vsel %vm651_vm1, %v655_v62, %v656_v5 }
 0x135   : > { %661 = vst [vmem:[%s346_s10 + $0x8] sm:$0xff] %v657_v9 }
 0x136   : > { %v674_v10 = vmul.f32 0.8, %v673_v7  ;;  %v679_v11 = vadd.f32 %v677_v8, %v662_v63 }
 0x138   : > { %v675_v14 = vadd.f32 -140.8, %v674_v10  ;;  %v680_v15 = vmul.f32 0.8, %v679_v11 }
 0x139   : > { %v1078_v17 = vpop.eup %1077 }
 0x13a   : > { %v681_v18 = vadd.f32 -40.0, %v680_v15  ;;  %v1080_v19 = vpop.eup %1079  ;;  %v690_v20 = vrot.slane %v675_v14, %v689_v12  ;;  %v694_v21 = vrot.slane %v675_v14, %v693_v13  ;;  %v712_v24 = vrot.slane %v1078_v17, 1 }
 0x13b   : > { %v713_v25 = vrot.slane %v1080_v19, 1 }
 0x13c   : > { %v701_v22 = vrot.slane %v681_v18, %v700_v16  ;;  %v705_v23 = vrot.slane %v681_v18, %v704_v1 }
 0x13e   : > { %v718_v26 = vsel %vm716_vm2, %v694_v21, %v705_v23  ;;  %v717_v27 = vsel %vm716_vm2, %v690_v20, %v701_v22 }
 0x13f   : > { %v721_v28 = vsel %vm719_vm3, %v718_v26, %v655_v62  ;;  %v720_v29 = vsel %vm719_vm3, %v717_v27, %v652_v61 }
 0x140   : > { %v723_v30 = vsel %vm722_vm4, %v720_v29, %v712_v24  ;;  %v724_v31 = vsel %vm722_vm4, %v721_v28, %v713_v25 }
 0x141   : > { %v726_v32 = vsel %vm725_vm5, %v723_v30, %v654_v6  ;;  %v727_v33 = vsel %vm725_vm5, %v724_v31, %v657_v9 }
 0x142   : > { %728 = vst [vmem:[%s356_s13] sm:$0xff] %v726_v32  ;;  %729 = vst [vmem:[%s356_s13 + $0x8] sm:$0xff] %v727_v33 }
 0x143 PF: > { %s17_s23 = sadd.s32 1, %s1103_s23   ;;  %s1341_s21 = smov %s1099_s22 }
 0x144   : > { %p14_p5 = scmp.ge.s32.totalorder %s17_s23, 4   ;;  %s1342_s22 = smov %s1344_s24 }
 0x146   :  { %16 = sbr.rel (!%p14_p5) target bundleno = 2 (0x2), region = 93 }

</bundles_post_ra>
